<compile_context>
chip_gen: v7x
topology: tpu7x:2x2x1
jax: 0.10.0
libtpu: 0.0.40
codegen_flags: <defaults>
</compile_context>

<pallas_src>
import functools

import jax
import jax.numpy as jnp
from jax import lax
from jax.experimental import pallas as pl
from jax.experimental.pallas import tpu as pltpu

NEG_SLOPE = 0.01  # F.leaky_relu default


def _leaky_relu(v):
    # Element-wise on the VPU, kept in f32 (friendly to v5e's f32-only VPU).
    return jnp.where(v > 0, v, NEG_SLOPE * v)


def ae_kernel(x_ref, w1_ref, b1_ref, w2_ref, b2_ref, b3_ref, b4_ref,
              out_ref, h_ref):
    """One batch-tile of the full forward pass (4 matmuls + 3 leaky_relus).

    x_ref  : (TB, in_feats)    input dtype (cast to weight dtype in-kernel)
    w1_ref : (hid, in_feats)   enc_dense1.weight (compute dtype, resident)
    b1_ref : (1, hid)          f32
    w2_ref : (h_feats, hid)    enc_dense2.weight (compute dtype, resident)
    b2_ref : (1, h_feats)      f32
    b3_ref : (1, hid)          dec_dense1.bias   f32
    b4_ref : (1, in_feats)     dec_dense2.bias   f32
    out_ref: (TB, in_feats)    out_dtype
    h_ref  : (TB, h_feats)     out_dtype
    """
    w1 = w1_ref[...]                     # (hid, in_feats) -- stored layout, never transposed
    w2 = w2_ref[...]                     # (h_feats, hid)
    x = x_ref[...].astype(w1.dtype)      # in-kernel cast (no extra HBM pass)

    # enc_dense1: x @ W1.T  == contract x[-1] with w1[-1]  (no .T materialized)
    h1 = lax.dot_general(x, w1, (((1,), (1,)), ((), ())),
                         preferred_element_type=jnp.float32)
    h1 = _leaky_relu(h1 + b1_ref[...])

    # enc_dense2: h1 @ W2.T == contract h1[-1] with w2[-1]
    h = lax.dot_general(h1.astype(w2.dtype), w2, (((1,), (1,)), ((), ())),
                        preferred_element_type=jnp.float32)
    h = _leaky_relu(h + b2_ref[...])

    # dec_dense1 (weight tied to W2.T): h @ W2 == contract h[-1] with w2[0]
    o1 = lax.dot_general(h.astype(w2.dtype), w2, (((1,), (0,)), ((), ())),
                         preferred_element_type=jnp.float32)
    o1 = _leaky_relu(o1 + b3_ref[...])

    # dec_dense2 (weight tied to W1.T): o1 @ W1 + b4   (no activation)
    out = lax.dot_general(o1.astype(w1.dtype), w1, (((1,), (0,)), ((), ())),
                          preferred_element_type=jnp.float32)
    out = out + b4_ref[...]

    out_ref[...] = out.astype(out_ref.dtype)
    h_ref[...] = h.astype(h_ref.dtype)


def _round_up(n, m):
    return ((n + m - 1) // m) * m


def _auto_batch_tile(b):
    """Single step for small batches; otherwise >=~6 steps (>=3 per v7x TC)."""
    b8 = _round_up(b, 8)
    if b8 <= 256:
        return b8
    tile = _round_up(-(-b8 // 6), 8)          # ceil(b8/6), 8-row aligned
    return max(128, min(tile, 1024))          # cap keeps tiles v7x-VMEM-friendly


def _vmem_budget_bytes(batch_tile, in_feats, hid, h_feats,
                       x_itemsize, w_itemsize, out_itemsize):
    """Rough VMEM budget: double-buffered I/O tiles + resident weights + f32 temps."""
    tiles = 2 * batch_tile * (in_feats * x_itemsize            # x (double-buffered)
                              + in_feats * out_itemsize        # out
                              + h_feats * out_itemsize)        # h
    weights = 2 * w_itemsize * (hid * in_feats + h_feats * hid)
    biases = 4 * (2 * hid + h_feats + in_feats) * 2
    temps = 4 * batch_tile * (hid + h_feats + hid + in_feats)  # h1, h, o1, out (f32)
    est = int(1.5 * (tiles + weights + biases + temps))
    return max(32 * 1024 * 1024, min(est, 64 * 1024 * 1024))


def ae_forward(x, params, *, batch_tile=None,
               compute_dtype=jnp.float32, out_dtype=jnp.float32):
    """Forward pass. Batch-tiled 1-D parallel grid; weights resident across steps.

    compute_dtype : dtype of the matmul *weights* (wrapper-cast; tiny + resident).
                    x is passed through untouched and cast in-kernel.
                    bf16 is the v6e/v7x sweet spot; keep f32 on v5e.
    out_dtype     : dtype of the `out` / `h` writeback. bf16 on v6e/v7x cuts
                    HBM writeback roughly in half on this memory-bound kernel.
    """
    w1, b1, w2, b2, b3, b4 = params
    B, in_feats = x.shape
    hid = w1.shape[0]
    h_feats = w2.shape[0]

    # Cast only the resident weights; biases / element-wise stay f32; x untouched.
    w1_c = w1.astype(compute_dtype)
    w2_c = w2.astype(compute_dtype)
    b1_c = b1.reshape(1, -1).astype(jnp.float32)
    b2_c = b2.reshape(1, -1).astype(jnp.float32)
    b3_c = b3.reshape(1, -1).astype(jnp.float32)
    b4_c = b4.reshape(1, -1).astype(jnp.float32)

    if batch_tile is None:
        batch_tile = _auto_batch_tile(B)
    batch_tile = _round_up(batch_tile, 8)

    # Pad batch up to a multiple of the tile so a simple 1-D parallel grid works.
    grid_b = pl.cdiv(B, batch_tile)
    b_pad = grid_b * batch_tile
    x_in = x if b_pad == B else jnp.pad(x, ((0, b_pad - B), (0, 0)))

    out_isize = jnp.dtype(out_dtype).itemsize
    vmem_limit = _vmem_budget_bytes(batch_tile, in_feats, hid, h_feats,
                                    x_in.dtype.itemsize,
                                    jnp.dtype(compute_dtype).itemsize,
                                    out_isize)

    # Advisory cost estimate (helps XLA overlap producers/consumers around the call).
    flops = 2 * b_pad * (2 * in_feats * hid + 2 * hid * h_feats)
    bytes_accessed = (b_pad * in_feats * x_in.dtype.itemsize
                      + b_pad * (in_feats + h_feats) * out_isize
                      + (hid * in_feats + h_feats * hid)
                      * jnp.dtype(compute_dtype).itemsize
                      + 4 * (2 * hid + h_feats + in_feats))
    cost = pl.CostEstimate(flops=flops, transcendentals=0,
                           bytes_accessed=bytes_accessed)

    out, h = pl.pallas_call(
        ae_kernel,
        out_shape=(
            jax.ShapeDtypeStruct((b_pad, in_feats), out_dtype),
            jax.ShapeDtypeStruct((b_pad, h_feats), out_dtype),
        ),
        grid_spec=pl.GridSpec(
            grid=(grid_b,),
            in_specs=[
                pl.BlockSpec((batch_tile, in_feats), lambda i: (i, 0)),  # x tile
                pl.BlockSpec((hid, in_feats), lambda i: (0, 0)),          # w1 (resident)
                pl.BlockSpec((1, hid), lambda i: (0, 0)),                 # b1
                pl.BlockSpec((h_feats, hid), lambda i: (0, 0)),           # w2 (resident)
                pl.BlockSpec((1, h_feats), lambda i: (0, 0)),             # b2
                pl.BlockSpec((1, hid), lambda i: (0, 0)),                 # b3
                pl.BlockSpec((1, in_feats), lambda i: (0, 0)),            # b4
            ],
            out_specs=(
                pl.BlockSpec((batch_tile, in_feats), lambda i: (i, 0)),   # out tile
                pl.BlockSpec((batch_tile, h_feats), lambda i: (i, 0)),    # h tile
            ),
        ),
        compiler_params=pltpu.CompilerParams(
            dimension_semantics=("parallel",),   # megacore sharding on v7x
            vmem_limit_bytes=vmem_limit,
        ),
        cost_estimate=cost,
    )(x_in, w1_c, b1_c, w2_c, b2_c, b3_c, b4_c)

    if b_pad != B:
        out = out[:B]
        h = h[:B]
    return out, h


def init_params(key, in_feats, h_feats):
    """Deterministic synthetic parameters matching AE_Model.__init__ shapes."""
    hid = int(in_feats * 0.8)
    k1, k2, k3, k4, k5, k6 = jax.random.split(key, 6)

    def unif(k, shape, fan_in):
        bound = 1.0 / jnp.sqrt(fan_in)
        return jax.random.uniform(k, shape, jnp.float32, -bound, bound)

    w1 = unif(k1, (hid, in_feats), in_feats)   # enc_dense1.weight
    b1 = unif(k2, (hid,), in_feats)            # enc_dense1.bias
    w2 = unif(k3, (h_feats, hid), hid)         # enc_dense2.weight
    b2 = unif(k4, (h_feats,), hid)             # enc_dense2.bias
    b3 = unif(k5, (hid,), h_feats)             # dec_dense1.bias (weight tied = W2.T)
    b4 = unif(k6, (in_feats,), hid)            # dec_dense2.bias (weight tied = W1.T)
    return (w1, b1, w2, b2, b3, b4)


def reference_forward(x, params):
    """Pure-JAX reference mirroring the PyTorch forward exactly (f32)."""
    w1, b1, w2, b2, b3, b4 = params
    h = jax.nn.leaky_relu(x @ w1.T + b1, NEG_SLOPE)
    h = jax.nn.leaky_relu(h @ w2.T + b2, NEG_SLOPE)
    out = jax.nn.leaky_relu(h @ w2 + b3, NEG_SLOPE)
    out = out @ w1 + b4
    return out, h


if __name__ == "__main__":
    key = jax.random.PRNGKey(0)
    kx, kp = jax.random.split(key)

    B = 64          # small test batch (single grid step via auto batch_tile)
    in_feats = 160  # -> hid = int(160 * 0.8) = 128 (lane-aligned hidden width)
    h_feats = 128   # lane-aligned encoding width -> unmasked stores for h

    x = jax.random.normal(kx, (B, in_feats), jnp.float32)
    params = init_params(kp, in_feats, h_feats)
    ref_out, ref_h = reference_forward(x, params)

    # f32 path: tight check against the pure-JAX reference.
    out, h = ae_forward(x, params)  # auto batch_tile, f32 compute + f32 outputs
    out = jax.block_until_ready(out)
    h = jax.block_until_ready(h)
    assert out.shape == (B, in_feats) and h.shape == (B, h_feats)
    assert jnp.allclose(out, ref_out, atol=5e-4, rtol=5e-4)
    assert jnp.allclose(h, ref_h, atol=5e-4, rtol=5e-4)

    # bf16 weights + bf16 outputs (v6e / v7x path): loose check.
    # Note: intermediate activations round to bf16 between layers; acceptable
    # for inference, document if `h` is consumed as an embedding downstream.
    out_bf, h_bf = ae_forward(x, params, compute_dtype=jnp.bfloat16,
                              out_dtype=jnp.bfloat16)
    out_bf = jax.block_until_ready(out_bf)
    h_bf = jax.block_until_ready(h_bf)
    assert out_bf.dtype == jnp.bfloat16 and h_bf.dtype == jnp.bfloat16
    assert jnp.allclose(out_bf.astype(jnp.float32), ref_out, atol=2e-1, rtol=5e-2)
    assert jnp.allclose(h_bf.astype(jnp.float32), ref_h, atol=2e-1, rtol=5e-2)

    # Ragged batch: wrapper pads to an 8-row-aligned tile and slices back.
    out_r, h_r = ae_forward(x[:37], params)
    out_r = jax.block_until_ready(out_r)
    assert out_r.shape == (37, in_feats) and h_r.shape == (37, h_feats)
    assert jnp.allclose(out_r, ref_out[:37], atol=5e-4, rtol=5e-4)

    # Multi-step grid path (explicit small tile) to exercise batch pipelining.
    out_m, h_m = ae_forward(x, params, batch_tile=16)
    out_m = jax.block_until_ready(out_m)
    assert jnp.allclose(out_m, ref_out, atol=5e-4, rtol=5e-4)
    assert jnp.allclose(h_m, ref_h, atol=5e-4, rtol=5e-4)

    print("KERNEL_OK")
</pallas_src>

<mosaic_0001>
module attributes {stable_mosaic.version = 11 : i64} {
  func.func @ae_kernel(%arg0: i32, %arg1: memref<64x160xf32, #tpu.memory_space<vmem>>, %arg2: memref<128x160xf32, #tpu.memory_space<vmem>>, %arg3: memref<1x128xf32, #tpu.memory_space<vmem>>, %arg4: memref<128x128xf32, #tpu.memory_space<vmem>>, %arg5: memref<1x128xf32, #tpu.memory_space<vmem>>, %arg6: memref<1x128xf32, #tpu.memory_space<vmem>>, %arg7: memref<1x160xf32, #tpu.memory_space<vmem>>, %arg8: memref<64x160xf32, #tpu.memory_space<vmem>>, %arg9: memref<64x128xf32, #tpu.memory_space<vmem>>) attributes {dimension_semantics = [#tpu.dimension_semantics<parallel>], iteration_bounds = array<i64: 1>, scalar_prefetch = 0 : i64, scratch_operands = 0 : i64, tpu.core_type = #tpu.core_type<tc>, window_params = [{transform_indices = @transform_0, window_bounds = array<i64: 64, 160>}, {pipeline_mode = #tpu.pipeline_mode<synchronous>, transform_indices = @transform_1, window_bounds = array<i64: 128, 160>}, {pipeline_mode = #tpu.pipeline_mode<synchronous>, transform_indices = @transform_2, window_bounds = array<i64: 1, 128>}, {pipeline_mode = #tpu.pipeline_mode<synchronous>, transform_indices = @transform_3, window_bounds = array<i64: 128, 128>}, {pipeline_mode = #tpu.pipeline_mode<synchronous>, transform_indices = @transform_4, window_bounds = array<i64: 1, 128>}, {pipeline_mode = #tpu.pipeline_mode<synchronous>, transform_indices = @transform_5, window_bounds = array<i64: 1, 128>}, {pipeline_mode = #tpu.pipeline_mode<synchronous>, transform_indices = @transform_6, window_bounds = array<i64: 1, 160>}, {transform_indices = @transform_7, window_bounds = array<i64: 64, 160>}, {transform_indices = @transform_8, window_bounds = array<i64: 64, 128>}]} {
    %c0 = arith.constant 0 : index
    %c0_0 = arith.constant 0 : index
    %0 = vector.load %arg2[%c0, %c0_0] : memref<128x160xf32, #tpu.memory_space<vmem>>, vector<128x160xf32>
    %c0_1 = arith.constant 0 : index
    %c0_2 = arith.constant 0 : index
    %1 = vector.load %arg4[%c0_1, %c0_2] : memref<128x128xf32, #tpu.memory_space<vmem>>, vector<128x128xf32>
    %c0_3 = arith.constant 0 : index
    %c0_4 = arith.constant 0 : index
    %2 = vector.load %arg1[%c0_3, %c0_4] : memref<64x160xf32, #tpu.memory_space<vmem>>, vector<64x160xf32>
    %cst = arith.constant dense<0.000000e+00> : vector<64x128xf32>
    %3 = tpu.matmul %2, %0, %cst {dimension_numbers = #tpu.dot_dimension_numbers<[1], [1], [0], [0], [0, 0, 1, 0], [], []>} : vector<64x160xf32>, vector<128x160xf32>, vector<64x128xf32> -> vector<64x128xf32>
    %c0_5 = arith.constant 0 : index
    %c0_6 = arith.constant 0 : index
    %4 = vector.load %arg3[%c0_5, %c0_6] : memref<1x128xf32, #tpu.memory_space<vmem>>, vector<1x128xf32>
    %5 = vector.broadcast %4 : vector<1x128xf32> to vector<64x128xf32>
    %6 = arith.addf %3, %5 : vector<64x128xf32>
    %cst_7 = arith.constant 0.000000e+00 : f32
    %7 = vector.broadcast %cst_7 : f32 to vector<64x128xf32>
    %8 = arith.cmpf ogt, %6, %7 : vector<64x128xf32>
    %cst_8 = arith.constant 0.00999999977 : f32
    %9 = vector.broadcast %cst_8 : f32 to vector<64x128xf32>
    %10 = arith.mulf %9, %6 : vector<64x128xf32>
    %11 = arith.select %8, %6, %10 : vector<64x128xi1>, vector<64x128xf32>
    %cst_9 = arith.constant dense<0.000000e+00> : vector<64x128xf32>
    %12 = tpu.matmul %11, %1, %cst_9 {dimension_numbers = #tpu.dot_dimension_numbers<[1], [1], [0], [0], [0, 0, 1, 0], [], []>} : vector<64x128xf32>, vector<128x128xf32>, vector<64x128xf32> -> vector<64x128xf32>
    %c0_10 = arith.constant 0 : index
    %c0_11 = arith.constant 0 : index
    %13 = vector.load %arg5[%c0_10, %c0_11] : memref<1x128xf32, #tpu.memory_space<vmem>>, vector<1x128xf32>
    %14 = vector.broadcast %13 : vector<1x128xf32> to vector<64x128xf32>
    %15 = arith.addf %12, %14 : vector<64x128xf32>
    %cst_12 = arith.constant 0.000000e+00 : f32
    %16 = vector.broadcast %cst_12 : f32 to vector<64x128xf32>
    %17 = arith.cmpf ogt, %15, %16 : vector<64x128xf32>
    %cst_13 = arith.constant 0.00999999977 : f32
    %18 = vector.broadcast %cst_13 : f32 to vector<64x128xf32>
    %19 = arith.mulf %18, %15 : vector<64x128xf32>
    %20 = arith.select %17, %15, %19 : vector<64x128xi1>, vector<64x128xf32>
    %cst_14 = arith.constant dense<0.000000e+00> : vector<64x128xf32>
    %21 = tpu.matmul %20, %1, %cst_14 {dimension_numbers = #tpu.dot_dimension_numbers<[1], [0], [0], [1], [0, 0, 1, 1], [], []>} : vector<64x128xf32>, vector<128x128xf32>, vector<64x128xf32> -> vector<64x128xf32>
    %c0_15 = arith.constant 0 : index
    %c0_16 = arith.constant 0 : index
    %22 = vector.load %arg6[%c0_15, %c0_16] : memref<1x128xf32, #tpu.memory_space<vmem>>, vector<1x128xf32>
    %23 = vector.broadcast %22 : vector<1x128xf32> to vector<64x128xf32>
    %24 = arith.addf %21, %23 : vector<64x128xf32>
    %cst_17 = arith.constant 0.000000e+00 : f32
    %25 = vector.broadcast %cst_17 : f32 to vector<64x128xf32>
    %26 = arith.cmpf ogt, %24, %25 : vector<64x128xf32>
    %cst_18 = arith.constant 0.00999999977 : f32
    %27 = vector.broadcast %cst_18 : f32 to vector<64x128xf32>
    %28 = arith.mulf %27, %24 : vector<64x128xf32>
    %29 = arith.select %26, %24, %28 : vector<64x128xi1>, vector<64x128xf32>
    %cst_19 = arith.constant dense<0.000000e+00> : vector<64x160xf32>
    %30 = tpu.matmul %29, %0, %cst_19 {dimension_numbers = #tpu.dot_dimension_numbers<[1], [0], [0], [1], [0, 0, 1, 1], [], []>} : vector<64x128xf32>, vector<128x160xf32>, vector<64x160xf32> -> vector<64x160xf32>
    %c0_20 = arith.constant 0 : index
    %c0_21 = arith.constant 0 : index
    %31 = vector.load %arg7[%c0_20, %c0_21] : memref<1x160xf32, #tpu.memory_space<vmem>>, vector<1x160xf32>
    %32 = vector.broadcast %31 : vector<1x160xf32> to vector<64x160xf32>
    %33 = arith.addf %30, %32 : vector<64x160xf32>
    %c0_22 = arith.constant 0 : index
    %c0_23 = arith.constant 0 : index
    %34 = vector.load %arg8[%c0_22, %c0_23] : memref<64x160xf32, #tpu.memory_space<vmem>>, vector<64x160xf32>
    tpu.vector_store %arg8[%c0_22, %c0_23], %33 {strides = array<i32>} : memref<64x160xf32, #tpu.memory_space<vmem>>, vector<64x160xf32>,
    %c0_24 = arith.constant 0 : index
    %c0_25 = arith.constant 0 : index
    %35 = vector.load %arg9[%c0_24, %c0_25] : memref<64x128xf32, #tpu.memory_space<vmem>>, vector<64x128xf32>
    tpu.vector_store %arg9[%c0_24, %c0_25], %20 {strides = array<i32>} : memref<64x128xf32, #tpu.memory_space<vmem>>, vector<64x128xf32>,
    return
  }
  func.func @transform_0(%arg0: i32) -> (i32, i32) {
    %c0_i32 = arith.constant 0 : i32
    %c0_i32_0 = arith.constant 0 : i32
    return %arg0, %c0_i32 : i32, i32
  }
  func.func @transform_1(%arg0: i32) -> (i32, i32) {
    %c0_i32 = arith.constant 0 : i32
    %c0_i32_0 = arith.constant 0 : i32
    %c0_i32_1 = arith.constant 0 : i32
    return %c0_i32, %c0_i32_0 : i32, i32
  }
  func.func @transform_2(%arg0: i32) -> (i32, i32) {
    %c0_i32 = arith.constant 0 : i32
    %c0_i32_0 = arith.constant 0 : i32
    %c0_i32_1 = arith.constant 0 : i32
    return %c0_i32, %c0_i32_0 : i32, i32
  }
  func.func @transform_3(%arg0: i32) -> (i32, i32) {
    %c0_i32 = arith.constant 0 : i32
    %c0_i32_0 = arith.constant 0 : i32
    %c0_i32_1 = arith.constant 0 : i32
    return %c0_i32, %c0_i32_0 : i32, i32
  }
  func.func @transform_4(%arg0: i32) -> (i32, i32) {
    %c0_i32 = arith.constant 0 : i32
    %c0_i32_0 = arith.constant 0 : i32
    %c0_i32_1 = arith.constant 0 : i32
    return %c0_i32, %c0_i32_0 : i32, i32
  }
  func.func @transform_5(%arg0: i32) -> (i32, i32) {
    %c0_i32 = arith.constant 0 : i32
    %c0_i32_0 = arith.constant 0 : i32
    %c0_i32_1 = arith.constant 0 : i32
    return %c0_i32, %c0_i32_0 : i32, i32
  }
  func.func @transform_6(%arg0: i32) -> (i32, i32) {
    %c0_i32 = arith.constant 0 : i32
    %c0_i32_0 = arith.constant 0 : i32
    %c0_i32_1 = arith.constant 0 : i32
    return %c0_i32, %c0_i32_0 : i32, i32
  }
  func.func @transform_7(%arg0: i32) -> (i32, i32) {
    %c0_i32 = arith.constant 0 : i32
    %c0_i32_0 = arith.constant 0 : i32
    return %arg0, %c0_i32 : i32, i32
  }
  func.func @transform_8(%arg0: i32) -> (i32, i32) {
    %c0_i32 = arith.constant 0 : i32
    %c0_i32_0 = arith.constant 0 : i32
    return %arg0, %c0_i32 : i32, i32
  }
}

</mosaic_0001>

<bundles_post_ra>
// kernel: tpu_custom_call.1
= control target key start
LH: loop header
LB: loop body
LE: loop exit
PB: predicated region body
PF: predicated region fallthrough
CT: control target
= control target key end

     0   :  { %14 = vsyncpa [#allocation3], 0  ;;  %vm101_vm0 = vcmask 261120   ;;  %s1516_s0 = inlined_call_operand.vmem [shape: f32[64,160], index: 0, kind: input, shape index: {}]   ;;  %s1517_s1 = inlined_call_operand.vmem [shape: f32[128,160], index: 1, kind: input, shape index: {}]   ;;  %s1518_s2 = inlined_call_operand.vmem [shape: f32[1,128], index: 2, kind: input, shape index: {}]   ;;  %s1519_s3 = inlined_call_operand.vmem [shape: f32[128,128], index: 3, kind: input, shape index: {}]   ;;  %s1520_s4 = inlined_call_operand.vmem [shape: f32[1,128], index: 4, kind: input, shape index: {}]   ;;  %s1521_s5 = inlined_call_operand.vmem [shape: f32[1,128], index: 5, kind: input, shape index: {}]   ;;  %s1522_s6 = inlined_call_operand.vmem [shape: f32[1,160], index: 6, kind: input, shape index: {}]   ;;  %s1523_s7 = inlined_call_operand.hbm [shape: f32[64,160], index: 7, kind: output, shape index: {0}]   ;;  %s1524_s8 = inlined_call_operand.hbm [shape: f32[64,128], index: 8, kind: output, shape index: {1}]  }
   0x1   :  { %v31_v0 = vld [vmem:[%s1517_s1 + $0x8] sm:$0xff]  ;;  %v33_v1 = vld [vmem:[%s1517_s1 + $0x18] sm:$0xff]  ;;  %v30_v2 = vld [vmem:[%s1517_s1] sm:$0xff] }
   0x2   :  { %v1171_v3 = vpack.c.bf16 %v33_v1, %v31_v0  ;;  %vm1175_vm1 = vmpackc.low %vm101_vm0, %vm101_vm0  ;;  %v32_v5 = vld [vmem:[%s1517_s1 + $0x10] sm:$0xff]  ;;  %v35_v6 = vld [vmem:[%s1517_s1 + $0x28] sm:$0xff] }
   0x3   :  { %v1185_v7 = vpack.c.bf16 %v32_v5, %v30_v2  ;;  %v37_v8 = vld [vmem:[%s1517_s1 + $0x38] sm:$0xff]  ;;  %v34_v10 = vld [vmem:[%s1517_s1 + $0x20] sm:$0xff]  ;;  %v36_v11 = vld [vmem:[%s1517_s1 + $0x30] sm:$0xff] }
   0x4   :  { %921 = vmatprep.subr.msk.bf16.mxu0 %vm1175_vm1, %v1171_v3  ;;  %v1193_v9 = vpack.c.bf16 %v37_v8, %v35_v6  ;;  %v39_v12 = vld [vmem:[%s1517_s1 + $0x48] sm:$0xff]  ;;  %v41_v13 = vld [vmem:[%s1517_s1 + $0x58] sm:$0xff]  ;;  %v1211_v14 = vpack.c.bf16 %v36_v11, %v34_v10  ;;  %v38_v17 = vld [vmem:[%s1517_s1 + $0x40] sm:$0xff] }
   0x5   :  { %923 = vmatpush1.bf16.xpose.msra.mxu0 %v1185_v7  ;;  %v1213_v15 = vpack.c.bf16 %v41_v13, %v39_v12  ;;  %v79_v16 = vld [vmem:[%s1516_s0 + $0x8] sm:$0xff]  ;;  %v40_v18 = vld [vmem:[%s1517_s1 + $0x50] sm:$0xff]  ;;  %v45_v20 = vld [vmem:[%s1517_s1 + $0x78] sm:$0xff] }
   0x6   :  { %926 = vmatprep.subr.msk.bf16.mxu0 %vm1175_vm1, %v1193_v9  ;;  %773 = vmatprep.mubr.msk.f32.mxu0 %vm101_vm0, %v79_v16  ;;  %v43_v19 = vld [vmem:[%s1517_s1 + $0x68] sm:$0xff]  ;;  %v1235_v21 = vpack.c.bf16 %v40_v18, %v38_v17  ;;  %v62_v22 = vld [vmem:[%s1519_s3] sm:$0xff]  ;;  %v64_v26 = vld [vmem:[%s1519_s3 + $0x10] sm:$0xff] }
   0x7   :  { %v63_v23 = vld [vmem:[%s1519_s3 + $0x8] sm:$0xff]  ;;  %v1243_v24 = vpack.c.bf16 %v45_v20, %v43_v19  ;;  %v65_v27 = vld [vmem:[%s1519_s3 + $0x18] sm:$0xff]  ;;  %v42_v29 = vld [vmem:[%s1517_s1 + $0x60] sm:$0xff] }
   0x8   :  { %v1245_v25 = vpack.c.bf16 %v63_v23, %v62_v22  ;;  %v1253_v28 = vpack.c.bf16 %v65_v27, %v64_v26  ;;  %v44_v30 = vld [vmem:[%s1517_s1 + $0x70] sm:$0xff]  ;;  %v47_v31 = vld [vmem:[%s1517_s1 + $0x88] sm:$0xff] }
   0xa   :  { %960 = vmatprep.subr.bf16.mxu1 %v1245_v25 }
   0xb   :  { %962 = vmatpush3.bf16.xpose.msra.mxu1 %v1245_v25 }
   0xc   :  { %964 = vmatprep.subr.bf16.mxu1 %v1253_v28 }
   0xd   :  { %928 = vmatpush1.bf16.xpose.msra.mxu0 %v1211_v14 }
   0xe   :  { %931 = vmatprep.subr.msk.bf16.mxu0 %vm1175_vm1, %v1213_v15 }
  0x15   :  { %933 = vmatpush1.bf16.xpose.msra.mxu0 %v1235_v21 }
  0x16   :  { %936 = vmatprep.subr.msk.bf16.mxu0 %vm1175_vm1, %v1243_v24 }
  0x17   :  { %15 = vsyncpa [#allocation5], 0  ;;  %v49_v32 = vld [vmem:[%s1517_s1 + $0x98] sm:$0xff]  ;;  %v66_v33 = vld [vmem:[%s1519_s3 + $0x20] sm:$0xff]  ;;  %v1280_v35 = vpack.c.bf16 %v44_v30, %v42_v29  ;;  %966 = vmatpush3.bf16.xpose.msra.mxu1 %v1253_v28 }
  0x18   :  { %v67_v34 = vld [vmem:[%s1519_s3 + $0x28] sm:$0xff]  ;;  %v1282_v36 = vpack.c.bf16 %v49_v32, %v47_v31  ;;  %v46_v38 = vld [vmem:[%s1517_s1 + $0x80] sm:$0xff]  ;;  %v48_v39 = vld [vmem:[%s1517_s1 + $0x90] sm:$0xff] }
  0x19   :  { %v1284_v37 = vpack.c.bf16 %v67_v34, %v66_v33  ;;  %v51_v40 = vld [vmem:[%s1517_s1 + $0xa8] sm:$0xff]  ;;  %v53_v41 = vld [vmem:[%s1517_s1 + $0xb8] sm:$0xff]  ;;  %v68_v42 = vld [vmem:[%s1519_s3 + $0x30] sm:$0xff]  ;;  %v1310_v44 = vpack.c.bf16 %v48_v39, %v46_v38 }
  0x1a   :  { %v69_v43 = vld [vmem:[%s1519_s3 + $0x38] sm:$0xff]  ;;  %v1312_v45 = vpack.c.bf16 %v53_v41, %v51_v40  ;;  %v50_v47 = vld [vmem:[%s1517_s1 + $0xa0] sm:$0xff]  ;;  %v52_v48 = vld [vmem:[%s1517_s1 + $0xb0] sm:$0xff] }
  0x1b   :  { %968 = vmatprep.subr.bf16.mxu1 %v1284_v37  ;;  %v1314_v46 = vpack.c.bf16 %v69_v43, %v68_v42  ;;  %v55_v49 = vld [vmem:[%s1517_s1 + $0xc8] sm:$0xff]  ;;  %v57_v50 = vld [vmem:[%s1517_s1 + $0xd8] sm:$0xff]  ;;  %v70_v51 = vld [vmem:[%s1519_s3 + $0x40] sm:$0xff]  ;;  %v1340_v53 = vpack.c.bf16 %v52_v48, %v50_v47 }
  0x1c   :  { %v71_v52 = vld [vmem:[%s1519_s3 + $0x48] sm:$0xff]  ;;  %v1342_v54 = vpack.c.bf16 %v57_v50, %v55_v49  ;;  %v54_v56 = vld [vmem:[%s1517_s1 + $0xc0] sm:$0xff]  ;;  %v56_v57 = vld [vmem:[%s1517_s1 + $0xd0] sm:$0xff] }
  0x1d   :  { %938 = vmatpush1.bf16.xpose.msra.mxu0 %v1280_v35  ;;  %v975_v55 = vpack.c.bf16 %v71_v52, %v70_v51  ;;  %v59_v58 = vld [vmem:[%s1517_s1 + $0xe8] sm:$0xff]  ;;  %v61_v59 = vld [vmem:[%s1517_s1 + $0xf8] sm:$0xff]  ;;  %v72_v60 = vld [vmem:[%s1519_s3 + $0x50] sm:$0xff]  ;;  %v1367_v62 = vpack.c.bf16 %v56_v57, %v54_v56 }
  0x1e   :  { %941 = vmatprep.subr.msk.bf16.mxu0 %vm1175_vm1, %v1282_v36  ;;  %v73_v61 = vld [vmem:[%s1519_s3 + $0x58] sm:$0xff]  ;;  %v1369_v63 = vpack.c.bf16 %v61_v59, %v59_v58  ;;  %v58_v1 = vld [vmem:[%s1517_s1 + $0xe0] sm:$0xff]  ;;  %v60_v2 = vld [vmem:[%s1517_s1 + $0xf0] sm:$0xff] }
  0x1f   :  { %970 = vmatpush3.bf16.xpose.msra.mxu1 %v1284_v37  ;;  %v979_v0 = vpack.c.bf16 %v73_v61, %v72_v60  ;;  %v74_v5 = vld [vmem:[%s1519_s3 + $0x60] sm:$0xff]  ;;  %v75_v6 = vld [vmem:[%s1519_s3 + $0x68] sm:$0xff]  ;;  %v1387_v8 = vpack.c.bf16 %v60_v2, %v58_v1  ;;  %v81_v11 = vld [vmem:[%s1516_s0 + $0x18] sm:$0xff] }
  0x20   :  { %972 = vmatprep.subr.bf16.mxu1 %v1314_v46  ;;  %v983_v4 = vpack.c.bf16 %v75_v6, %v74_v5  ;;  %v78_v10 = vld [vmem:[%s1516_s0] sm:$0xff]  ;;  %v80_v12 = vld [vmem:[%s1516_s0 + $0x10] sm:$0xff]  ;;  %v83_v13 = vld [vmem:[%s1516_s0 + $0x28] sm:$0xff] }
  0x21   :  { %v82_v16 = vld [vmem:[%s1516_s0 + $0x20] sm:$0xff]  ;;  %v85_v17 = vld [vmem:[%s1516_s0 + $0x38] sm:$0xff]  ;;  %v84_v18 = vld [vmem:[%s1516_s0 + $0x30] sm:$0xff] }
  0x22   :  { %v87_v19 = vld [vmem:[%s1516_s0 + $0x48] sm:$0xff]  ;;  %v86_v20 = vld [vmem:[%s1516_s0 + $0x40] sm:$0xff]  ;;  %v89_v22 = vld [vmem:[%s1516_s0 + $0x58] sm:$0xff] }
  0x23   :  { %v88_v23 = vld [vmem:[%s1516_s0 + $0x50] sm:$0xff]  ;;  %v90_v26 = vld [vmem:[%s1516_s0 + $0x60] sm:$0xff]  ;;  %v93_v27 = vld [vmem:[%s1516_s0 + $0x78] sm:$0xff] }
  0x24   :  { %v76_v29 = vld [vmem:[%s1519_s3 + $0x70] sm:$0xff]  ;;  %v77_v30 = vld [vmem:[%s1519_s3 + $0x78] sm:$0xff]  ;;  %v756_v32 = vld [vmem:[%s1518_s2] ss:$0 sm:$0xff] }
  0x25   :  { %943 = vmatpush1.bf16.xpose.msra.mxu0 %v1310_v44  ;;  %v987_v31 = vpack.c.bf16 %v77_v30, %v76_v29 }
  0x26   :  { %946 = vmatprep.subr.msk.bf16.mxu0 %vm1175_vm1, %v1312_v45 }
  0x27   :  { %974 = vmatpush3.bf16.xpose.msra.mxu1 %v1314_v46 }
  0x28   :  { %976 = vmatprep.subr.bf16.mxu1 %v975_v55 }
  0x2d   :  { %948 = vmatpush1.bf16.xpose.msra.mxu0 %v1340_v53 }
  0x2e   :  { %951 = vmatprep.subr.msk.bf16.mxu0 %vm1175_vm1, %v1342_v54 }
  0x2f   :  { %978 = vmatpush3.bf16.xpose.msra.mxu1 %v975_v55 }
  0x30   :  { %980 = vmatprep.subr.bf16.mxu1 %v979_v0 }
  0x35   :  { %953 = vmatpush1.bf16.xpose.msra.mxu0 %v1367_v62 }
  0x36   :  { %956 = vmatprep.subr.msk.bf16.mxu0 %vm1175_vm1, %v1369_v63 }
  0x37   :  { %982 = vmatpush3.bf16.xpose.msra.mxu1 %v979_v0 }
  0x38   :  { %984 = vmatprep.subr.bf16.mxu1 %v983_v4 }
  0x3d   :  { %958 = vmatpush1.bf16.xpose.msra.mxu0 %v1387_v8 }
  0x3e   :  { %992 = vmatprep.subr.bf16.mxu0 %v1245_v25 }
  0x3f   :  { %986 = vmatpush3.bf16.xpose.msra.mxu1 %v983_v4 }
  0x40   :  { %988 = vmatprep.subr.bf16.mxu1 %v987_v31 }
  0x44   :  { %239 = vmatmul.mubr.f32.vlgmr.msra.gmra.mrb[0].mxu0 %v78_v10 }
  0x45   :  { %774 = vmatprep.mubr.msk.f32.mxu0 %vm101_vm0, %v81_v11  ;;  %994 = vmatpush3.bf16.msra.mxu0 %v1245_v25  ;;  %v91_v25 = vld [vmem:[%s1516_s0 + $0x68] sm:$0xff] }
  0x46   :  { %996 = vmatprep.subr.bf16.mxu0 %v1253_v28 }
  0x47   :  { %990 = vmatpush3.bf16.xpose.msra.mxu1 %v987_v31 }
  0x48   :  { %244 = vmatmul.mubr.f32.gmra.mrb[2].mxu0 %v80_v12  ;;  %1024 = vmatprep.subr.bf16.mxu1 %v1171_v3 }
  0x49   :  { %775 = vmatprep.mubr.msk.f32.mxu0 %vm101_vm0, %v83_v13  ;;  %998 = vmatpush3.bf16.msra.mxu0 %v1253_v28  ;;  %v92_v28 = vld [vmem:[%s1516_s0 + $0x70] sm:$0xff] }
  0x4a   :  { %1000 = vmatprep.subr.bf16.mxu0 %v1284_v37 }
  0x4c   :  { %249 = vmatmul.mubr.f32.gmra.mrb[4].mxu0 %v82_v16 }
  0x4d   :  { %776 = vmatprep.mubr.msk.f32.mxu0 %vm101_vm0, %v85_v17  ;;  %1002 = vmatpush3.bf16.msra.mxu0 %v1284_v37 }
  0x4e   :  { %1004 = vmatprep.subr.bf16.mxu0 %v1314_v46 }
  0x50   :  { %254 = vmatmul.mubr.f32.gmra.mrb[6].mxu0 %v84_v18 }
  0x51   :  { %777 = vmatprep.mubr.msk.f32.mxu0 %vm101_vm0, %v87_v19  ;;  %1006 = vmatpush3.bf16.msra.mxu0 %v1314_v46 }
  0x52   :  { %1008 = vmatprep.subr.bf16.mxu0 %v975_v55 }
  0x54   :  { %259 = vmatmul.mubr.f32.gmra.mrb[8].mxu0 %v86_v20 }
  0x55   :  { %778 = vmatprep.mubr.msk.f32.mxu0 %vm101_vm0, %v89_v22  ;;  %1010 = vmatpush3.bf16.msra.mxu0 %v975_v55 }
  0x56   :  { %1012 = vmatprep.subr.bf16.mxu0 %v979_v0 }
  0x58   :  { %264 = vmatmul.mubr.f32.gmra.mrb[10].mxu0 %v88_v23 }
  0x59   :  { %779 = vmatprep.mubr.msk.f32.mxu0 %vm101_vm0, %v91_v25  ;;  %1014 = vmatpush3.bf16.msra.mxu0 %v979_v0 }
  0x5a   :  { %1016 = vmatprep.subr.bf16.mxu0 %v983_v4 }
  0x5c   :  { %269 = vmatmul.mubr.f32.gmra.mrb[12].mxu0 %v90_v26 }
  0x5d   :  { %780 = vmatprep.mubr.msk.f32.mxu0 %vm101_vm0, %v93_v27  ;;  %1018 = vmatpush3.bf16.msra.mxu0 %v983_v4 }
  0x5e   :  { %1020 = vmatprep.subr.bf16.mxu0 %v987_v31 }
  0x60   :  { %274 = vmatmul.mubr.f32.gmra.mrb[14].mxu0 %v92_v28 }
  0x61   :  { %1022 = vmatpush3.bf16.msra.mxu0 %v987_v31 }
 0x117   :  { %v240_v33 = vpop.f32.mrb[0].mxu0 }
 0x118   :  { %v241_v34 = vadd.f32 %v756_v32, %v240_v33  ;;  %v242_v37 = vpop.f32.mrb[1].mxu0 }
 0x11a   :  { %vm279_vm2 = vcmp.gt.f32.partialorder %v241_v34, 0.0  ;;  %v287_v38 = vmul.f32 0.01, %v241_v34 }
 0x11b   :  { %v245_v39 = vpop.f32.mrb[2].mxu0 }
 0x11c   :  { %v246_v40 = vadd.f32 %v756_v32, %v245_v39  ;;  %v247_v41 = vpop.f32.mrb[3].mxu0  ;;  %v295_v42 = vsel %vm279_vm2, %v241_v34, %v287_v38 }
 0x11d   :  { %863 = vmatprep.mubr.f32.mxu1 %v295_v42 }
 0x11e   :  { %v288_v43 = vmul.f32 0.01, %v246_v40  ;;  %vm280_vm3 = vcmp.gt.f32.partialorder %v246_v40, 0.0 }
 0x11f   :  { %v250_v46 = vpop.f32.mrb[4].mxu0 }
 0x120   :  { %v251_v47 = vadd.f32 %v756_v32, %v250_v46  ;;  %v252_v48 = vpop.f32.mrb[5].mxu0  ;;  %v296_v3 = vsel %vm280_vm3, %v246_v40, %v288_v43  ;;  %v1110_v46 = vmov 0.0  }
 0x121   :  { %864 = vmatmul.mubr.f32.vlgmr.msra.gmra.mrb[0].mxu1 %v296_v3 }
 0x122   :  { %v289_v49 = vmul.f32 0.01, %v251_v47  ;;  %vm281_vm4 = vcmp.gt.f32.partialorder %v251_v47, 0.0  ;;  %1026 = vmatpush1.bf16.msra.mxu1 %v1185_v7 }
 0x123   :  { %v255_v50 = vpop.f32.mrb[6].mxu0  ;;  %1028 = vmatprep.subr.bf16.mxu1 %v1193_v9 }
 0x124   :  { %v256_v51 = vadd.f32 %v756_v32, %v255_v50  ;;  %v257_v52 = vpop.f32.mrb[7].mxu0  ;;  %v297_v55 = vsel %vm281_vm4, %v251_v47, %v289_v49  ;;  %v782_v47 = vld [vmem:[%s1521_s5] ss:$0 sm:$0xff]  ;;  %s1111_s5 = smov [#allocation4]  }
 0x125   :  { %866 = vmatprep.mubr.f32.mxu1 %v297_v55  ;;  %s741_s23 = sshll.u32 %s1111_s5, 4  ;;  %s742_s23 = int_to_ptr.vmem [resolvable:$true] %s741_s23 }
 0x126   :  { %v290_v56 = vmul.f32 0.01, %v256_v51  ;;  %vm282_vm5 = vcmp.gt.f32.partialorder %v256_v51, 0.0  ;;  %1030 = vmatpush1.bf16.msra.mxu1 %v1211_v14  ;;  %s1062_s24 = scalar_lea.vmem %s742_s23, 1024  ;;  %p1067_p1 = scmp.lt.s32.totalorder %s742_s23, %s742_s23 }
 0x127   :  { %v260_v57 = vpop.f32.mrb[8].mxu0  ;;  %1032 = vmatprep.subr.bf16.mxu1 %v1213_v15  ;;  %p1063_p0 = scmp.ne.s32.totalorder %s742_s23, %s1062_s24  ;;  %p1068_p2 = scmp.lt.s32.totalorder %s1062_s24, %s1062_s24 }
 0x128   :  { %v261_v58 = vadd.f32 %v756_v32, %v260_v57  ;;  %v262_v59 = vpop.f32.mrb[9].mxu0  ;;  %v298_v60 = vsel %vm282_vm5, %v256_v51, %v290_v56 }
 0x129   :  { %867 = vmatmul.mubr.f32.gmra.mrb[2].mxu1 %v298_v60  ;;  %p1069_p3 = por %p1068_p2, %p1067_p1 }
 0x12a   :  { %v291_v61 = vmul.f32 0.01, %v261_v58  ;;  %vm283_vm6 = vcmp.gt.f32.partialorder %v261_v58, 0.0  ;;  %1034 = vmatpush1.bf16.msra.mxu1 %v1235_v21 }
 0x12b   :  { %v265_v7 = vpop.f32.mrb[10].mxu0  ;;  %1036 = vmatprep.subr.bf16.mxu1 %v1243_v24  ;;  %p1070_p4 = pnand %p1069_p3, %p1063_p0 }
 0x12c   :  { %v266_v9 = vadd.f32 %v756_v32, %v265_v7  ;;  %v267_v0 = vpop.f32.mrb[11].mxu0  ;;  %v299_v1 = vsel %vm283_vm6, %v261_v58, %v291_v61 }
 0x12d   :  { %869 = vmatprep.mubr.f32.mxu1 %v299_v1 }
 0x12e   :  { %v292_v2 = vmul.f32 0.01, %v266_v9  ;;  %vm284_vm7 = vcmp.gt.f32.partialorder %v266_v9, 0.0  ;;  %1038 = vmatpush1.bf16.msra.mxu1 %v1280_v35 }
 0x12f   :  { %v270_v14 = vpop.f32.mrb[12].mxu0  ;;  %1040 = vmatprep.subr.bf16.mxu1 %v1282_v36  ;;  %v781_v36 = vld [vmem:[%s1520_s4] ss:$0 sm:$0xff] }
 0x130   :  { %v271_v15 = vadd.f32 %v756_v32, %v270_v14  ;;  %v272_v5 = vpop.f32.mrb[13].mxu0  ;;  %v300_v6 = vsel %vm284_vm7, %v266_v9, %v292_v2 }
 0x131   :  { %870 = vmatmul.mubr.f32.gmra.mrb[4].mxu1 %v300_v6 }
 0x132   :  { %v293_v4 = vmul.f32 0.01, %v271_v15  ;;  %vm285_vm8 = vcmp.gt.f32.partialorder %v271_v15, 0.0  ;;  %1042 = vmatpush1.bf16.msra.mxu1 %v1310_v44 }
 0x133   :  { %v275_v21 = vpop.f32.mrb[14].mxu0  ;;  %1044 = vmatprep.subr.bf16.mxu1 %v1312_v45 }
 0x134   :  { %v276_v24 = vadd.f32 %v756_v32, %v275_v21  ;;  %v277_v10 = vpop.f32.mrb[15].mxu0  ;;  %v301_v11 = vsel %vm285_vm8, %v271_v15, %v293_v4 }
 0x135   :  { %872 = vmatprep.mubr.f32.mxu1 %v301_v11 }
 0x136   :  { %v294_v12 = vmul.f32 0.01, %v276_v24  ;;  %vm286_vm9 = vcmp.gt.f32.partialorder %v276_v24, 0.0  ;;  %1046 = vmatpush1.bf16.msra.mxu1 %v1340_v53 }
 0x137   :  { %1048 = vmatprep.subr.bf16.mxu1 %v1342_v54 }
 0x138   :  { %v302_v35 = vsel %vm286_vm9, %v276_v24, %v294_v12 }
 0x139   :  { %873 = vmatmul.mubr.f32.gmra.mrb[6].mxu1 %v302_v35 }
 0x13a   :  { %1050 = vmatpush1.bf16.msra.mxu1 %v1367_v62  ;;  %651 = vmatprep.mubr.f32.mxu1 %v1110_v46 }
 0x13b   :  { %1052 = vmatprep.subr.bf16.mxu1 %v1369_v63 }
 0x13e   :  { %1054 = vmatpush1.bf16.msra.mxu1 %v1387_v8 }
 0x1f4   :  { %v865_v44 = vpop.f32.mrb[0].mxu1 }
 0x1f5   :  { %v382_v45 = vadd.f32 %v865_v44, %v781_v36  ;;  %v376_v13 = vpop.f32.mrb[1].mxu1 }
 0x1f6   :  { %v377_v16 = vadd.f32 %v781_v36, %v376_v13 }
 0x1f7   :  { %vm416_vm10 = vcmp.gt.f32.partialorder %v382_v45, 0.0  ;;  %v424_v53 = vmul.f32 0.01, %v382_v45 }
 0x1f8   :  { %v423_v17 = vmul.f32 0.01, %v377_v16  ;;  %vm415_vm11 = vcmp.gt.f32.partialorder %v377_v16, 0.0 }
 0x1f9   :  { %v432_v54 = vsel %vm416_vm10, %v382_v45, %v424_v53 }
 0x1fa   :  { %717 = vst [vmem:[#allocation4 + $0x8] sm:$0xff] %v432_v54  ;;  %v431_v18 = vsel %vm415_vm11, %v377_v16, %v423_v17 }
 0x1fb   :  { %907 = vmatprep.mubr.f32.mxu0 %v431_v18  ;;  %716 = vst [vmem:[#allocation4] sm:$0xff] %v431_v18 }
 0x1fc   :  { %v868_v62 = vpop.f32.mrb[2].mxu1  ;;  %908 = vmatmul.mubr.f32.vlgmr.msra.gmra.mrb[16].mxu0 %v432_v54 }
 0x1fd   :  { %v392_v63 = vadd.f32 %v868_v62, %v781_v36  ;;  %v386_v8 = vpop.f32.mrb[3].mxu1 }
 0x1fe   :  { %v387_v19 = vadd.f32 %v781_v36, %v386_v8 }
 0x1ff   :  { %v426_v20 = vmul.f32 0.01, %v392_v63  ;;  %vm418_vm12 = vcmp.gt.f32.partialorder %v392_v63, 0.0 }
 0x200   :  { %v425_v22 = vmul.f32 0.01, %v387_v19  ;;  %vm417_vm13 = vcmp.gt.f32.partialorder %v387_v19, 0.0 }
 0x201   :  { %v434_v23 = vsel %vm418_vm12, %v392_v63, %v426_v20 }
 0x202   :  { %v433_v25 = vsel %vm417_vm13, %v387_v19, %v425_v22  ;;  %719 = vst [vmem:[#allocation4 + $0x18] sm:$0xff] %v434_v23 }
 0x203   :  { %910 = vmatprep.mubr.f32.mxu0 %v433_v25  ;;  %718 = vst [vmem:[#allocation4 + $0x10] sm:$0xff] %v433_v25 }
 0x204   :  { %v871_v26 = vpop.f32.mrb[4].mxu1  ;;  %911 = vmatmul.mubr.f32.gmra.mrb[18].mxu0 %v434_v23 }
 0x205   :  { %v402_v27 = vadd.f32 %v871_v26, %v781_v36  ;;  %v396_v28 = vpop.f32.mrb[5].mxu1 }
 0x206   :  { %v397_v29 = vadd.f32 %v781_v36, %v396_v28 }
 0x207   :  { %v428_v30 = vmul.f32 0.01, %v402_v27  ;;  %vm420_vm14 = vcmp.gt.f32.partialorder %v402_v27, 0.0 }
 0x208   :  { %v427_v31 = vmul.f32 0.01, %v397_v29  ;;  %vm419_vm15 = vcmp.gt.f32.partialorder %v397_v29, 0.0 }
 0x209   :  { %v436_v32 = vsel %vm420_vm14, %v402_v27, %v428_v30 }
 0x20a   :  { %v435_v33 = vsel %vm419_vm15, %v397_v29, %v427_v31  ;;  %721 = vst [vmem:[#allocation4 + $0x28] sm:$0xff] %v436_v32 }
 0x20b   :  { %913 = vmatprep.mubr.f32.mxu0 %v435_v33  ;;  %720 = vst [vmem:[#allocation4 + $0x20] sm:$0xff] %v435_v33 }
 0x20c   :  { %v874_v34 = vpop.f32.mrb[6].mxu1  ;;  %914 = vmatmul.mubr.f32.gmra.mrb[20].mxu0 %v436_v32 }
 0x20d   :  { %v412_v37 = vadd.f32 %v874_v34, %v781_v36  ;;  %v406_v38 = vpop.f32.mrb[7].mxu1 }
 0x20e   :  { %v407_v39 = vadd.f32 %v781_v36, %v406_v38 }
 0x20f   :  { %v430_v40 = vmul.f32 0.01, %v412_v37  ;;  %vm422_vm1 = vcmp.gt.f32.partialorder %v412_v37, 0.0 }
 0x210   :  { %v429_v41 = vmul.f32 0.01, %v407_v39  ;;  %vm421_vm2 = vcmp.gt.f32.partialorder %v407_v39, 0.0 }
 0x211   :  { %v438_v42 = vsel %vm422_vm1, %v412_v37, %v430_v40 }
 0x212   :  { %v437_v43 = vsel %vm421_vm2, %v407_v39, %v429_v41  ;;  %723 = vst [vmem:[#allocation4 + $0x38] sm:$0xff] %v438_v42 }
 0x213   :  { %916 = vmatprep.mubr.f32.mxu0 %v437_v43  ;;  %722 = vst [vmem:[#allocation4 + $0x30] sm:$0xff] %v437_v43 }
 0x214   :  { %917 = vmatmul.mubr.f32.gmra.mrb[22].mxu0 %v438_v42 }
 0x2cf   :  { %v909_v48 = vpop.f32.mrb[16].mxu0 }
 0x2d0   :  { %v512_v3 = vpop.f32.mrb[17].mxu0  ;;  %v518_v49 = vadd.f32 %v909_v48, %v782_v47 }
 0x2d1   :  { %v513_v50 = vadd.f32 %v782_v47, %v512_v3 }
 0x2d2   :  { %v560_v52 = vmul.f32 0.01, %v518_v49  ;;  %vm552_vm4 = vcmp.gt.f32.partialorder %v518_v49, 0.0 }
 0x2d3   :  { %vm551_vm3 = vcmp.gt.f32.partialorder %v513_v50, 0.0  ;;  %v559_v51 = vmul.f32 0.01, %v513_v50 }
 0x2d4   :  { %v568_v60 = vsel %vm552_vm4, %v518_v49, %v560_v52 }
 0x2d5   :  { %v567_v55 = vsel %vm551_vm3, %v513_v50, %v559_v51 }
 0x2d6   :  { %652 = vmatmul.mubr.f32.vlgmr.msra.gmra.mrb[8].mxu1 %v567_v55 }
 0x2d7   :  { %v912_v56 = vpop.f32.mrb[18].mxu0  ;;  %657 = vmatprep.mubr.f32.mxu1 %v1110_v46 }
 0x2d8   :  { %v522_v57 = vpop.f32.mrb[19].mxu0  ;;  %v528_v58 = vadd.f32 %v912_v56, %v782_v47 }
 0x2d9   :  { %v523_v59 = vadd.f32 %v782_v47, %v522_v57 }
 0x2da   :  { %658 = vmatmul.mubr.f32.gmra.mrb[10].mxu1 %v568_v60  ;;  %v562_v7 = vmul.f32 0.01, %v528_v58  ;;  %vm554_vm6 = vcmp.gt.f32.partialorder %v528_v58, 0.0 }
 0x2db   :  { %v561_v61 = vmul.f32 0.01, %v523_v59  ;;  %663 = vmatprep.mubr.f32.mxu1 %v1110_v46  ;;  %vm553_vm5 = vcmp.gt.f32.partialorder %v523_v59, 0.0 }
 0x2dc   :  { %v570_v15 = vsel %vm554_vm6, %v528_v58, %v562_v7 }
 0x2dd   :  { %v569_v9 = vsel %vm553_vm5, %v523_v59, %v561_v61 }
 0x2de   :  { %664 = vmatmul.mubr.f32.gmra.mrb[12].mxu1 %v569_v9 }
 0x2df   :  { %v915_v0 = vpop.f32.mrb[20].mxu0  ;;  %669 = vmatprep.mubr.f32.mxu1 %v1110_v46 }
 0x2e0   :  { %v532_v1 = vpop.f32.mrb[21].mxu0  ;;  %v538_v2 = vadd.f32 %v915_v0, %v782_v47 }
 0x2e1   :  { %v533_v14 = vadd.f32 %v782_v47, %v532_v1 }
 0x2e2   :  { %670 = vmatmul.mubr.f32.gmra.mrb[14].mxu1 %v570_v15  ;;  %v564_v6 = vmul.f32 0.01, %v538_v2  ;;  %vm556_vm8 = vcmp.gt.f32.partialorder %v538_v2, 0.0 }
 0x2e3   :  { %v563_v5 = vmul.f32 0.01, %v533_v14  ;;  %675 = vmatprep.mubr.f32.mxu1 %v1110_v46  ;;  %vm555_vm7 = vcmp.gt.f32.partialorder %v533_v14, 0.0 }
 0x2e4   :  { %v572_v12 = vsel %vm556_vm8, %v538_v2, %v564_v6 }
 0x2e5   :  { %v571_v4 = vsel %vm555_vm7, %v533_v14, %v563_v5 }
 0x2e6   :  { %676 = vmatmul.mubr.f32.gmra.mrb[16].mxu1 %v571_v4 }
 0x2e7   :  { %v918_v21 = vpop.f32.mrb[22].mxu0  ;;  %681 = vmatprep.mubr.f32.mxu1 %v1110_v46 }
 0x2e8   :  { %v542_v24 = vpop.f32.mrb[23].mxu0  ;;  %v548_v10 = vadd.f32 %v918_v21, %v782_v47 }
 0x2e9   :  { %v543_v11 = vadd.f32 %v782_v47, %v542_v24 }
 0x2ea   :  { %682 = vmatmul.mubr.f32.gmra.mrb[18].mxu1 %v572_v12  ;;  %v566_v36 = vmul.f32 0.01, %v548_v10  ;;  %vm558_vm10 = vcmp.gt.f32.partialorder %v548_v10, 0.0 }
 0x2eb   :  { %v565_v35 = vmul.f32 0.01, %v543_v11  ;;  %687 = vmatprep.mubr.f32.mxu1 %v1110_v46  ;;  %vm557_vm9 = vcmp.gt.f32.partialorder %v543_v11, 0.0 }
 0x2ec   :  { %v574_v45 = vsel %vm558_vm10, %v548_v10, %v566_v36 }
 0x2ed   :  { %v573_v44 = vsel %vm557_vm9, %v543_v11, %v565_v35 }
 0x2ee   :  { %688 = vmatmul.mubr.f32.gmra.mrb[20].mxu1 %v573_v44 }
 0x2ef   :  { %693 = vmatprep.mubr.f32.mxu1 %v1110_v46 }
 0x2f2   :  { %694 = vmatmul.mubr.f32.gmra.mrb[22].mxu1 %v574_v45 }
 0x2f3   :  { %1073 = shalt.err (!%p1070_p4)
}
 0x2f4   :  { %s1074_s27 = scalar_lea.hbm %s1524_s8, 1024 }
 0x2f5   :  { %p1075_p5 = scmp.ne.s32.totalorder %s1524_s8, %s1074_s27  ;;  %p1078_p6 = scmp.lt.u32.totalorder %s1074_s27, %s1524_s8 }
 0x2f7   :  { %p1080_p7 = pnand %p1078_p6, %p1075_p5 }
 0x2f9   :  { %1083 = shalt.err (!%p1080_p7)
}
 0x2fa   :  { %s1112_s10 = smov 128   ;;  %s1113_s11 = smov 8   ;;  %v577_v13 = vlaneseq  ;;  %v575_v17 = vld [vmem:[%s1522_s6] sm:$0x3] }
 0x2fb   :  { %747 = dma.vmem_to_hbm [thread:$0]  %s742_s23, 1024, %s1524_s8, [#allocation5], %s1112_s10, %s1112_s10, %s1113_s11  }
 0x2fc   :  { %v578_v16 = vshrl.u32 %v577_v13, 7  ;;  %s1114_s6 = smov [#allocation2]  }
 0x2fd   :  { %s729_s8 = sshll.u32 %s1114_s6, 4  ;;  %s730_s8 = int_to_ptr.vmem [resolvable:$true] %s729_s8 }
 0x2fe   :  { %v579_v53 = vsub.s32 0, %v578_v16  ;;  %v583_v54 = vsub.s32 1, %v578_v16  ;;  %s1084_s15 = scalar_lea.vmem %s730_s8, 2048  ;;  %p1089_p9 = scmp.lt.s32.totalorder %s730_s8, %s730_s8 }
 0x2ff   :  { %p1085_p8 = scmp.ne.s32.totalorder %s730_s8, %s1084_s15  ;;  %p1090_p10 = scmp.lt.s32.totalorder %s1084_s15, %s1084_s15 }
 0x300   :  { %v580_v18 = vrot.slane %v575_v17, %v579_v53  ;;  %v584_v62 = vrot.slane %v575_v17, %v583_v54 }
 0x301   :  { %p1091_p11 = por %p1090_p10, %p1089_p9 }
 0x303   :  { %p1092_p12 = pnand %p1091_p11, %p1085_p8 }
 0x3a9   :  { %v653_v63 = vpop.f32.mrb[8].mxu1 }
 0x3aa   :  { %v654_v8 = vadd.f32 %v653_v63, %v580_v18  ;;  %v655_v19 = vpop.f32.mrb[9].mxu1 }
 0x3ab   :  { %v656_v20 = vadd.f32 %v655_v19, %v584_v62 }
 0x3ac   :  { %700 = vst [vmem:[#allocation2] sm:$0xff] %v654_v8 }
 0x3ad   :  { %701 = vst.msk [vmem:[#allocation2 + $0x8] sm:$0xff] %vm101_vm0, %v656_v20  ;;  %v659_v22 = vpop.f32.mrb[10].mxu1 }
 0x3ae   :  { %v660_v23 = vadd.f32 %v659_v22, %v580_v18  ;;  %v661_v25 = vpop.f32.mrb[11].mxu1 }
 0x3af   :  { %v662_v26 = vadd.f32 %v661_v25, %v584_v62 }
 0x3b0   :  { %702 = vst [vmem:[#allocation2 + $0x10] sm:$0xff] %v660_v23 }
 0x3b1   :  { %703 = vst.msk [vmem:[#allocation2 + $0x18] sm:$0xff] %vm101_vm0, %v662_v26  ;;  %v665_v27 = vpop.f32.mrb[12].mxu1 }
 0x3b2   :  { %v666_v28 = vadd.f32 %v665_v27, %v580_v18  ;;  %v667_v29 = vpop.f32.mrb[13].mxu1 }
 0x3b3   :  { %v668_v30 = vadd.f32 %v667_v29, %v584_v62 }
 0x3b4   :  { %704 = vst [vmem:[#allocation2 + $0x20] sm:$0xff] %v666_v28 }
 0x3b5   :  { %705 = vst.msk [vmem:[#allocation2 + $0x28] sm:$0xff] %vm101_vm0, %v668_v30  ;;  %v671_v31 = vpop.f32.mrb[14].mxu1 }
 0x3b6   :  { %v672_v32 = vadd.f32 %v671_v31, %v580_v18  ;;  %v673_v33 = vpop.f32.mrb[15].mxu1 }
 0x3b7   :  { %v674_v34 = vadd.f32 %v673_v33, %v584_v62 }
 0x3b8   :  { %706 = vst [vmem:[#allocation2 + $0x30] sm:$0xff] %v672_v32 }
 0x3b9   :  { %707 = vst.msk [vmem:[#allocation2 + $0x38] sm:$0xff] %vm101_vm0, %v674_v34  ;;  %v677_v37 = vpop.f32.mrb[16].mxu1 }
 0x3ba   :  { %v678_v38 = vadd.f32 %v677_v37, %v580_v18  ;;  %v679_v39 = vpop.f32.mrb[17].mxu1 }
 0x3bb   :  { %v680_v40 = vadd.f32 %v679_v39, %v584_v62 }
 0x3bc   :  { %708 = vst [vmem:[#allocation2 + $0x40] sm:$0xff] %v678_v38 }
 0x3bd   :  { %709 = vst.msk [vmem:[#allocation2 + $0x48] sm:$0xff] %vm101_vm0, %v680_v40  ;;  %v683_v41 = vpop.f32.mrb[18].mxu1 }
 0x3be   :  { %v684_v42 = vadd.f32 %v683_v41, %v580_v18  ;;  %v685_v43 = vpop.f32.mrb[19].mxu1 }
 0x3bf   :  { %v686_v46 = vadd.f32 %v685_v43, %v584_v62 }
 0x3c0   :  { %710 = vst [vmem:[#allocation2 + $0x50] sm:$0xff] %v684_v42 }
 0x3c1   :  { %711 = vst.msk [vmem:[#allocation2 + $0x58] sm:$0xff] %vm101_vm0, %v686_v46  ;;  %v689_v47 = vpop.f32.mrb[20].mxu1 }
 0x3c2   :  { %v690_v48 = vadd.f32 %v689_v47, %v580_v18  ;;  %v691_v3 = vpop.f32.mrb[21].mxu1 }
 0x3c3   :  { %v692_v49 = vadd.f32 %v691_v3, %v584_v62 }
 0x3c4   :  { %712 = vst [vmem:[#allocation2 + $0x60] sm:$0xff] %v690_v48 }
 0x3c5   :  { %713 = vst.msk [vmem:[#allocation2 + $0x68] sm:$0xff] %vm101_vm0, %v692_v49  ;;  %v695_v50 = vpop.f32.mrb[22].mxu1 }
 0x3c6   :  { %v696_v51 = vadd.f32 %v695_v50, %v580_v18  ;;  %v697_v52 = vpop.f32.mrb[23].mxu1 }
 0x3c7   :  { %v698_v55 = vadd.f32 %v697_v52, %v584_v62 }
 0x3c8   :  { %714 = vst [vmem:[#allocation2 + $0x70] sm:$0xff] %v696_v51 }
 0x3c9   :  { %715 = vst.msk [vmem:[#allocation2 + $0x78] sm:$0xff] %vm101_vm0, %v698_v55 }
 0x3ca   :  { %1095 = shalt.err (!%p1092_p12)
}
 0x3cb   :  { %s1096_s18 = scalar_lea.hbm %s1523_s7, 2048 }
 0x3cc   :  { %p1097_p13 = scmp.ne.s32.totalorder %s1523_s7, %s1096_s18  ;;  %p1100_p0 = scmp.lt.u32.totalorder %s1096_s18, %s1523_s7 }
 0x3ce   :  { %p1102_p1 = pnand %p1100_p0, %p1097_p13 }
 0x3d0   :  { %1105 = shalt.err (!%p1102_p1)
}
 0x3d1   :  { %s1115_s0 = smov 256   ;;  %s1116_s2 = smov 16  }
 0x3d2   :  { %735 = dma.vmem_to_hbm [thread:$0]  %s730_s8, 2048, %s1523_s7, [#allocation3], %s1115_s0, %s1115_s0, %s1116_s2  }
 0x3d3   :  { %1106 = dma.done.wait [#allocation3], 2048  }
 0x3d4   :  { %1107 = vsyncadd [#allocation3], 4294965248 }
 0x3d5   :  { %1108 = dma.done.wait [#allocation5], 1024  }
 0x3d6   :  { %1109 = vsyncadd [#allocation5], 4294966272 }
 0x3d7   :  { %754 = vsyncpa [#allocation3], 1 }
 0x3d8   :  { %755 = vsyncpa [#allocation5], 1 }

</bundles_post_ra>
